<compile_context>
chip_gen: v7x
topology: tpu7x:2x2x1
jax: 0.10.0
libtpu: 0.0.40
codegen_flags: <defaults>
</compile_context>

<pallas_src>
import jax
import jax.numpy as jnp
from jax import lax
from jax.experimental import pallas as pl
from jax.experimental.pallas import tpu as pltpu

_MIB = 1024 * 1024


def _round_up(x, m):
    return ((x + m - 1) // m) * m


def _round_down(x, m):
    return (x // m) * m


def _vmem_limit_bytes():
    """Generation-aware scoped-VMEM limit (~75% of physical per-core VMEM)."""
    try:
        cap = int(pltpu.get_tpu_info().vmem_capacity_bytes)
    except Exception:
        cap = 64 * _MIB  # conservative: safe on v7x, merely sub-optimal on v5e/v6e
    return max(32 * _MIB, min((cap * 3) // 4, 112 * _MIB))


def _make_kernel(tk, D):
    rem = D % tk  # nonzero only when the last K block is ragged (K-split path)

    def kernel(z_ref, w_ref, b_ref, o_ref, acc_ref):
        # z_ref: (tm, tk) VMEM   w_ref: (1, tk) VMEM   b_ref: (1, 1) SMEM
        # o_ref: (1, tm) VMEM    acc_ref: (1, tm) f32 VMEM scratch
        k = pl.program_id(1)
        nk = pl.num_programs(1)

        @pl.when(k == 0)
        def _():
            acc_ref[...] = jnp.zeros_like(acc_ref)

        z = z_ref[...]
        w = w_ref[...]
        if rem != 0:
            # Ragged last K block: zero out-of-range columns of BOTH operands so
            # uninitialized (possibly NaN) padding never reaches valid outputs.
            col = lax.broadcasted_iota(jnp.int32, (1, tk), 1)
            valid = jnp.logical_or(col < rem, k != nk - 1)
            w = jnp.where(valid, w, 0)
            z = jnp.where(valid, z, 0)

        # (1, tk) x (tm, tk), contracting both minor dims -> (1, tm) lane-dense.
        acc_ref[...] += lax.dot_general(
            w, z,
            dimension_numbers=(((1,), (1,)), ((), ())),
            preferred_element_type=jnp.float32,
        )

        @pl.when(k == nk - 1)
        def _():
            o_ref[...] = (acc_ref[...] + b_ref[0, 0]).astype(o_ref.dtype)

    return kernel


def embedding_clf_forward(z, weight, bias):
    """Forward pass of EmbeddingClf.

    z:      (B, ...)           -> flattened to (B, encoding_dim) (nn.Flatten)
    weight: (1, encoding_dim)  -> as in nn.Linear(encoding_dim, 1)
    bias:   (1,)
    returns (B, 1)
    """
    B = z.shape[0]
    z2 = z.reshape(B, -1)                 # nn.Flatten (glue, plain JAX)
    D = z2.shape[1]
    w = weight.reshape(1, D)              # lane-dense weight row (no transpose)
    b = bias.reshape(1, 1).astype(jnp.float32)

    itemsize = z2.dtype.itemsize
    row_bytes = D * itemsize
    NBUF = 2                              # BlockSpec double-buffering depth

    vmem_limit = _vmem_limit_bytes()
    # Headroom for output blocks, f32 accumulator, and Mosaic internal scratch.
    reserve_misc = 8 * _MIB
    w_whole_vmem = 8 * D * itemsize       # (1, D) whole-array operand, sublane-padded
    z_budget_full_d = vmem_limit - reserve_misc - w_whole_vmem

    # Target activation bytes per grid step (amortises ~0.35us/step overhead).
    target_tile = 16 * _MIB if vmem_limit >= 80 * _MIB else 8 * _MIB
    single_tile_bytes = 2 * _MIB

    fits_single = NBUF * B * row_bytes <= z_budget_full_d

    if (B <= 128 or B * row_bytes <= single_tile_bytes) and fits_single:
        # Path A: whole problem in one tile (block == full array, exempt from (8,128)).
        tm, tk = B, D
    elif z_budget_full_d >= NBUF * 128 * row_bytes:
        # Path B: tile over the batch only, full D per tile.
        tk = D
        tm = min(max(target_tile // row_bytes, 128),
                 z_budget_full_d // (NBUF * row_bytes))
        tm = max(_round_down(tm, 128), 128)
        cap = _round_up(B, 128)
        if B > 256:
            # Ensure >= 2 batch tiles so the "parallel" axis feeds both v7x TCs.
            cap = min(cap, _round_up((B + 1) // 2, 128))
        tm = min(tm, cap)
    else:
        # Path C: D too wide even for a 128-row full-D tile -> split the contraction.
        tm = B if B <= 128 else 128
        z_budget = vmem_limit - reserve_misc
        per_col = NBUF * (tm + 8) * itemsize        # z block + sublane-padded w block
        tk = min(z_budget // per_col, max(target_tile // (tm * itemsize), 128))
        tk = max(_round_down(tk, 128), 128)
        tk = min(tk, _round_up(D, 128))

    num_m = pl.cdiv(B, tm)
    num_k = pl.cdiv(D, tk)
    blocked_w = (tk != D)

    if blocked_w:
        w_spec = pl.BlockSpec((1, tk), lambda i, k: (0, k))
    else:
        # Constant weight: single whole-array VMEM copy, no double buffering.
        w_spec = pl.BlockSpec(memory_space=pltpu.MemorySpace.VMEM)

    out = pl.pallas_call(
        _make_kernel(tk, D),
        out_shape=jax.ShapeDtypeStruct((1, B), z2.dtype),
        grid_spec=pltpu.PrefetchScalarGridSpec(
            num_scalar_prefetch=0,
            grid=(num_m, num_k),
            in_specs=[
                pl.BlockSpec((tm, tk), lambda i, k: (i, k)),              # z tile
                w_spec,                                                    # weight
                pl.BlockSpec(memory_space=pltpu.MemorySpace.SMEM),         # bias scalar
            ],
            out_specs=pl.BlockSpec((1, tm), lambda i, k: (0, i)),          # lane-dense slab
            scratch_shapes=[pltpu.VMEM((1, tm), jnp.float32)],             # f32 accumulator
        ),
        compiler_params=pltpu.CompilerParams(
            dimension_semantics=("parallel", "arbitrary"),
            vmem_limit_bytes=vmem_limit,
        ),
        cost_estimate=pl.CostEstimate(
            flops=2 * B * D,
            transcendentals=0,
            bytes_accessed=itemsize * (B * D + D) + z2.dtype.itemsize * B + 4,
        ),
    )(z2, w, b)

    return out.reshape(B, 1)


if __name__ == "__main__":
    key = jax.random.PRNGKey(0)
    k_z, k_w, k_b = jax.random.split(key, 3)

    batch = 2
    encoding_dim = 32

    # Deterministic synthetic params (mimic nn.Linear default uniform init range).
    bound = 1.0 / jnp.sqrt(jnp.float32(encoding_dim))
    weight = jax.random.uniform(k_w, (1, encoding_dim), jnp.float32, -bound, bound)
    bias = jax.random.uniform(k_b, (1,), jnp.float32, -bound, bound)

    # Example embedding input with trailing structure so nn.Flatten is exercised.
    z = jax.random.normal(k_z, (batch, 4, 8), jnp.float32)   # 4*8 == encoding_dim

    out = embedding_clf_forward(z, weight, bias)
    out = jax.block_until_ready(out)

    # Reference check against plain JAX.
    ref = z.reshape(batch, -1) @ weight.T + bias
    assert out.shape == (batch, 1)
    assert jnp.allclose(out, ref, atol=1e-5, rtol=1e-5)

    print("KERNEL_OK")
</pallas_src>

<mosaic_0001>
module attributes {stable_mosaic.version = 11 : i64} {
  func.func @kernel(%arg0: i32, %arg1: i32, %arg2: memref<2x32xf32, #tpu.memory_space<vmem>>, %arg3: memref<1x32xf32, #tpu.memory_space<vmem>>, %arg4: memref<1x1xf32, #tpu.memory_space<smem>>, %arg5: memref<1x2xf32, #tpu.memory_space<vmem>>, %arg6: memref<1x2xf32, #tpu.memory_space<vmem>>) attributes {dimension_semantics = [#tpu.dimension_semantics<parallel>, #tpu.dimension_semantics<arbitrary>], iteration_bounds = array<i64: 1, 1>, scalar_prefetch = 0 : i64, scratch_operands = 1 : i64, tpu.core_type = #tpu.core_type<tc>, window_params = [{transform_indices = @transform_0, window_bounds = array<i64: 2, 32>}, {pipeline_mode = #tpu.pipeline_mode<synchronous>, transform_indices = @transform_1, window_bounds = array<i64: 1, 32>}, {transform_indices = @transform_2, window_bounds = array<i64: 1, 1>}, {transform_indices = @transform_3, window_bounds = array<i64: 1, 2>}]} {
    %c0_i32 = arith.constant 0 : i32
    %0 = arith.cmpi eq, %arg1, %c0_i32 : i32
    %1 = arith.extui %0 : i1 to i32
    %c0_i32_0 = arith.constant 0 : i32
    %2 = arith.cmpi ne, %1, %c0_i32_0 : i32
    scf.if %2 {
      %cst_10 = arith.constant 0.000000e+00 : f32
      %12 = vector.broadcast %cst_10 : f32 to vector<1x2xf32>
      %c0_11 = arith.constant 0 : index
      %c0_12 = arith.constant 0 : index
      %13 = vector.load %arg6[%c0_11, %c0_12] : memref<1x2xf32, #tpu.memory_space<vmem>>, vector<1x2xf32>
      tpu.vector_store %arg6[%c0_11, %c0_12], %12 {strides = array<i32>} : memref<1x2xf32, #tpu.memory_space<vmem>>, vector<1x2xf32>,
    } else {
    }
    %c0 = arith.constant 0 : index
    %c0_1 = arith.constant 0 : index
    %3 = vector.load %arg2[%c0, %c0_1] : memref<2x32xf32, #tpu.memory_space<vmem>>, vector<2x32xf32>
    %c0_2 = arith.constant 0 : index
    %c0_3 = arith.constant 0 : index
    %4 = vector.load %arg3[%c0_2, %c0_3] : memref<1x32xf32, #tpu.memory_space<vmem>>, vector<1x32xf32>
    %c0_4 = arith.constant 0 : index
    %c0_5 = arith.constant 0 : index
    %5 = vector.load %arg6[%c0_4, %c0_5] : memref<1x2xf32, #tpu.memory_space<vmem>>, vector<1x2xf32>
    %cst = arith.constant dense<0.000000e+00> : vector<1x2xf32>
    %6 = tpu.matmul %4, %3, %cst {dimension_numbers = #tpu.dot_dimension_numbers<[1], [1], [0], [0], [0, 0, 1, 0], [], []>} : vector<1x32xf32>, vector<2x32xf32>, vector<1x2xf32> -> vector<1x2xf32>
    %7 = arith.addf %5, %6 : vector<1x2xf32>
    %c0_6 = arith.constant 0 : index
    %c0_7 = arith.constant 0 : index
    %8 = vector.load %arg6[%c0_6, %c0_7] : memref<1x2xf32, #tpu.memory_space<vmem>>, vector<1x2xf32>
    tpu.vector_store %arg6[%c0_6, %c0_7], %7 {strides = array<i32>} : memref<1x2xf32, #tpu.memory_space<vmem>>, vector<1x2xf32>,
    %c0_i32_8 = arith.constant 0 : i32
    %9 = arith.cmpi eq, %arg1, %c0_i32_8 : i32
    %10 = arith.extui %9 : i1 to i32
    %c0_i32_9 = arith.constant 0 : i32
    %11 = arith.cmpi ne, %10, %c0_i32_9 : i32
    scf.if %11 {
      %c0_10 = arith.constant 0 : index
      %c0_11 = arith.constant 0 : index
      %12 = vector.load %arg6[%c0_10, %c0_11] : memref<1x2xf32, #tpu.memory_space<vmem>>, vector<1x2xf32>
      %c0_12 = arith.constant 0 : index
      %c0_13 = arith.constant 0 : index
      %13 = memref.load %arg4[%c0_12, %c0_13] : memref<1x1xf32, #tpu.memory_space<smem>>
      %14 = vector.broadcast %13 : f32 to vector<1x2xf32>
      %15 = arith.addf %12, %14 : vector<1x2xf32>
      %c0_14 = arith.constant 0 : index
      %c0_15 = arith.constant 0 : index
      %16 = vector.load %arg5[%c0_14, %c0_15] : memref<1x2xf32, #tpu.memory_space<vmem>>, vector<1x2xf32>
      tpu.vector_store %arg5[%c0_14, %c0_15], %15 {strides = array<i32>} : memref<1x2xf32, #tpu.memory_space<vmem>>, vector<1x2xf32>,
    } else {
    }
    return
  }
  func.func @transform_0(%arg0: i32, %arg1: i32) -> (i32, i32) {
    %c0_i32 = arith.constant 0 : i32
    return %arg0, %arg1 : i32, i32
  }
  func.func @transform_1(%arg0: i32, %arg1: i32) -> (i32, i32) {
    %c0_i32 = arith.constant 0 : i32
    %c0_i32_0 = arith.constant 0 : i32
    %c0_i32_1 = arith.constant 0 : i32
    return %c0_i32, %c0_i32_0 : i32, i32
  }
  func.func @transform_2(%arg0: i32, %arg1: i32) -> (i32, i32) {
    %c0_i32 = arith.constant 0 : i32
    %c0_i32_0 = arith.constant 0 : i32
    %c0_i32_1 = arith.constant 0 : i32
    return %c0_i32, %c0_i32_0 : i32, i32
  }
  func.func @transform_3(%arg0: i32, %arg1: i32) -> (i32, i32) {
    %c0_i32 = arith.constant 0 : i32
    %c0_i32_0 = arith.constant 0 : i32
    return %c0_i32, %arg0 : i32, i32
  }
}

</mosaic_0001>

<bundles_post_ra>
// kernel: tpu_custom_call.1
= control target key start
LH: loop header
LB: loop body
LE: loop exit
PB: predicated region body
PF: predicated region fallthrough
CT: control target
= control target key end

     0   :  { %vm20_vm0 = vcmask 8192   ;;  %vm25_vm1 = vcmask 261120   ;;  %v163_v1 = vmov 0.0   ;;  %vm164_vm2 = vmmov 0   ;;  %s210_s0 = inlined_call_operand.vmem [shape: f32[2,32], index: 0, kind: input, shape index: {}]   ;;  %s211_s1 = inlined_call_operand.vmem [shape: f32[1,32], index: 1, kind: input, shape index: {}]   ;;  %s212_s2 = inlined_call_operand.<no memory space> [shape: f32[1,1], index: 2, kind: input, shape index: {}]   ;;  %s213_s3 = inlined_call_operand.hbm [shape: f32[1,2], index: 3, kind: output, shape index: {}]  }
   0x1   :  { %v22_v0 = vld [vmem:[%s210_s0] sm:$0x3]  ;;  %21 = vst.msk [vmem:[#allocation2] sm:$0x1] %vm20_vm0, %v163_v1  ;;  %131 = vmatprep.subr.mxu0 %v163_v1  ;;  %133 = vmatprep.mubr.msk.f32.mxu0 %vm164_vm2, %v163_v1 }
   0x2   :  { %9 = vsyncpa [#allocation5], 0  ;;  %132 = vmatpush3.xpose.msk.msra.mxu0 %vm25_vm1, %v22_v0  ;;  %v23_v2 = vld [vmem:[%s211_s1] sm:$0x1]  ;;  %v110_v7 = vstv %s212_s2  ;;  %s165_s17 = smov [#allocation4]  }
   0x3   :  { %s119_s18 = sshll.u32 %s165_s17, 4  ;;  %s120_s18 = int_to_ptr.vmem [resolvable:$true] %s119_s18 }
   0x4   :  { %s139_s19 = scalar_lea.vmem %s120_s18, 16  ;;  %s143_s1 = scalar_lea.vmem %s120_s18, 32 }
   0x5   :  { %134 = vmatmul.mubr.msk.f32.vlgmr.msra.gmra.mrb[0].mxu0 %vm25_vm1, %v23_v2  ;;  %p140_p0 = scmp.ne.s32.totalorder %s120_s18, %s139_s19  ;;  %p144_p1 = scmp.lt.s32.totalorder %s120_s18, %s120_s18 }
   0x6   :  { %p145_p2 = scmp.lt.s32.totalorder %s143_s1, %s139_s19 }
   0x8   :  { %v24_v3 = vld [vmem:[#allocation2] sm:$0x1]  ;;  %p146_p3 = por %p145_p2, %p144_p1 }
   0xa   :  { %p147_p4 = pnand %p146_p3, %p140_p0 }
  0xd8   :  { %v98_v4 = vpop.f32.mrb[0].mxu0 }
  0xd9   :  { %v102_v5 = vadd.f32 %v98_v4, %v24_v3  ;;  %v135_v6 = vpop.f32.mrb[1].mxu0 }
  0xdb   :  { %104 = vst.msk [vmem:[#allocation2] sm:$0x1] %vm20_vm0, %v102_v5 }
  0xe2   :  { %v108_v8 = vld [vmem:[#allocation2] sm:$0x1] }
  0xe3   :  { %v111_v9 = vadd.f32 %v110_v7, %v108_v8 }
  0xe5   :  { %112 = vst.msk [vmem:[#allocation4] sm:$0x1] %vm20_vm0, %v111_v9 }
  0xe6   :  { %150 = shalt.err (!%p147_p4)
}
  0xe7   :  { %s151_s22 = scalar_lea.hbm %s213_s3, 16 }
  0xe8   :  { %p152_p5 = scmp.ne.s32.totalorder %s213_s3, %s151_s22  ;;  %p155_p6 = scmp.lt.u32.totalorder %s151_s22, %s213_s3 }
  0xea   :  { %p157_p7 = pnand %p155_p6, %p152_p5 }
  0xec   :  { %160 = shalt.err (!%p157_p7)
}
  0xed   :  { %122 = dma.vmem_to_hbm [thread:$0]  %s120_s18, 16, %s213_s3, [#allocation5]  }
  0xee   :  { %161 = dma.done.wait [#allocation5], 16  }
  0xef   :  { %162 = vsyncadd [#allocation5], 4294967280 }
  0xf0   :  { %126 = vsyncpa [#allocation5], 1 }

</bundles_post_ra>
